<compile_context>
chip_gen: v7x
topology: tpu7x:2x2x1
jax: 0.10.0
libtpu: 0.0.40
codegen_flags: <defaults>
</compile_context>

<pallas_src>
import functools
import math

import jax
import jax.numpy as jnp
from jax.experimental import pallas as pl
from jax.experimental.pallas import tpu as pltpu


def _round_up(v, m):
    return (v + m - 1) // m * m


def _linear_kernel(x_ref, w_ref, b_ref, o_ref, acc_ref):
    # x_ref: (tm, tk), w_ref: (tk, tn), b_ref: (1, tn), o_ref: (tm, tn)
    k = pl.program_id(2)

    @pl.when(k == 0)
    def _():
        acc_ref[...] = jnp.zeros_like(acc_ref)

    acc_ref[...] += jnp.dot(x_ref[...], w_ref[...],
                            preferred_element_type=jnp.float32)

    @pl.when(k == pl.num_programs(2) - 1)
    def _():
        o_ref[...] = (acc_ref[...]
                      + b_ref[...].astype(jnp.float32)).astype(o_ref.dtype)


@jax.jit
def linear(x, w, b):
    """Forward of nn.Linear: y = x @ w.T + b, w in (out_features, in_features)."""
    *lead, K = x.shape
    N, K_w = w.shape
    assert K == K_w, (K, K_w)
    M = math.prod(lead) if lead else 1

    x2 = x.reshape(M, K)
    wt = w.T                                  # (K, N)
    out_dtype = x.dtype

    # ---- tile selection (re-derived from shapes) ------------------------
    # tn multiple of 128 -> lane-dense output stores; tm up to 256 rows so a
    # grid step moves a sizable tile; tk = full K when K is not 128-aligned
    # (block equal to the full dim is legal and avoids padded K reads).
    tm = min(256, _round_up(M, 8))
    tn = min(512, _round_up(N, 128))
    if K % 128 == 0:
        tk = min(512, K)
    else:
        tk = K
        # TODO(synk): pad-and-tile K for very large, non-128-aligned K.

    Mp = _round_up(M, tm)
    Np = _round_up(N, tn)
    Kp = _round_up(K, tk)

    if (Mp, Kp) != (M, K):
        x2 = jnp.pad(x2, ((0, Mp - M), (0, Kp - K)))
    if (Kp, Np) != (K, N):
        wt = jnp.pad(wt, ((0, Kp - K), (0, Np - N)))
    b2 = (jnp.pad(b, (0, Np - N)) if Np != N else b).reshape(1, Np)

    grid = (Mp // tm, Np // tn, Kp // tk)

    itemsize = jnp.dtype(out_dtype).itemsize
    cost = pl.CostEstimate(
        flops=2 * M * N * K,
        transcendentals=0,
        bytes_accessed=(M * K + K * N + N + M * N) * itemsize,
    )

    out = pl.pallas_call(
        _linear_kernel,
        out_shape=jax.ShapeDtypeStruct((Mp, Np), out_dtype),
        grid_spec=pltpu.PrefetchScalarGridSpec(
            num_scalar_prefetch=0,
            grid=grid,
            in_specs=[
                pl.BlockSpec((tm, tk), lambda i, j, k: (i, k)),   # x tile
                pl.BlockSpec((tk, tn), lambda i, j, k: (k, j)),   # W^T tile
                pl.BlockSpec((1, tn), lambda i, j, k: (0, j)),    # bias tile
            ],
            out_specs=pl.BlockSpec((tm, tn), lambda i, j, k: (i, j)),
            scratch_shapes=[pltpu.VMEM((tm, tn), jnp.float32)],
        ),
        compiler_params=pltpu.CompilerParams(
            dimension_semantics=("parallel", "parallel", "arbitrary")),
        cost_estimate=cost,
    )(x2, wt, b2)

    out = out[:M, :N]
    return out.reshape(*lead, N)


if __name__ == "__main__":
    key = jax.random.PRNGKey(0)
    kx, kw, kb = jax.random.split(key, 3)

    # Module config: Linear(nch_in=32, nch_out=64); input (batch=2, seq=8, 32)
    nch_in, nch_out = 32, 64
    x = jax.random.normal(kx, (2, 8, nch_in), dtype=jnp.float32)
    w = jax.random.normal(kw, (nch_out, nch_in), dtype=jnp.float32) * 0.1
    b = jax.random.normal(kb, (nch_out,), dtype=jnp.float32) * 0.1

    y = linear(x, w, b)
    jax.block_until_ready(y)
    assert y.shape == (2, 8, nch_out)

    ref = jnp.einsum("bsk,nk->bsn", x, w) + b
    assert jnp.allclose(y, ref, atol=1e-2, rtol=1e-2)

    # Also exercise the padding path once (unaligned out_features, 2-D input).
    nch_out2 = 100
    w_u = jax.random.normal(kw, (nch_out2, 16), dtype=jnp.float32) * 0.1
    b_u = jax.random.normal(kb, (nch_out2,), dtype=jnp.float32) * 0.1
    x_u = jax.random.normal(kx, (4, 16), dtype=jnp.float32)
    y_u = linear(x_u, w_u, b_u)
    jax.block_until_ready(y_u)
    assert y_u.shape == (4, nch_out2)
    ref_u = x_u @ w_u.T + b_u
    assert jnp.allclose(y_u, ref_u, atol=1e-2, rtol=1e-2)

    print("KERNEL_OK")
</pallas_src>

<mosaic_0001>
module attributes {stable_mosaic.version = 11 : i64} {
  func.func @_linear_kernel(%arg0: i32, %arg1: i32, %arg2: i32, %arg3: memref<16x32xf32, #tpu.memory_space<vmem>>, %arg4: memref<32x128xf32, #tpu.memory_space<vmem>>, %arg5: memref<1x128xf32, #tpu.memory_space<vmem>>, %arg6: memref<16x128xf32, #tpu.memory_space<vmem>>, %arg7: memref<16x128xf32, #tpu.memory_space<vmem>>) attributes {dimension_semantics = [#tpu.dimension_semantics<parallel>, #tpu.dimension_semantics<parallel>, #tpu.dimension_semantics<arbitrary>], iteration_bounds = array<i64: 1, 1, 1>, scalar_prefetch = 0 : i64, scratch_operands = 1 : i64, tpu.core_type = #tpu.core_type<tc>, window_params = [{transform_indices = @transform_0, window_bounds = array<i64: 16, 32>}, {transform_indices = @transform_1, window_bounds = array<i64: 32, 128>}, {transform_indices = @transform_2, window_bounds = array<i64: 1, 128>}, {transform_indices = @transform_3, window_bounds = array<i64: 16, 128>}]} {
    %c0_i32 = arith.constant 0 : i32
    %0 = arith.cmpi eq, %arg2, %c0_i32 : i32
    %1 = arith.extui %0 : i1 to i32
    %c0_i32_0 = arith.constant 0 : i32
    %2 = arith.cmpi ne, %1, %c0_i32_0 : i32
    scf.if %2 {
      %cst_10 = arith.constant 0.000000e+00 : f32
      %12 = vector.broadcast %cst_10 : f32 to vector<16x128xf32>
      %c0_11 = arith.constant 0 : index
      %c0_12 = arith.constant 0 : index
      %13 = vector.load %arg7[%c0_11, %c0_12] : memref<16x128xf32, #tpu.memory_space<vmem>>, vector<16x128xf32>
      tpu.vector_store %arg7[%c0_11, %c0_12], %12 {strides = array<i32>} : memref<16x128xf32, #tpu.memory_space<vmem>>, vector<16x128xf32>,
    } else {
    }
    %c0 = arith.constant 0 : index
    %c0_1 = arith.constant 0 : index
    %3 = vector.load %arg7[%c0, %c0_1] : memref<16x128xf32, #tpu.memory_space<vmem>>, vector<16x128xf32>
    %c0_2 = arith.constant 0 : index
    %c0_3 = arith.constant 0 : index
    %4 = vector.load %arg3[%c0_2, %c0_3] : memref<16x32xf32, #tpu.memory_space<vmem>>, vector<16x32xf32>
    %c0_4 = arith.constant 0 : index
    %c0_5 = arith.constant 0 : index
    %5 = vector.load %arg4[%c0_4, %c0_5] : memref<32x128xf32, #tpu.memory_space<vmem>>, vector<32x128xf32>
    %cst = arith.constant dense<0.000000e+00> : vector<16x128xf32>
    %6 = tpu.matmul %4, %5, %cst {dimension_numbers = #tpu.dot_dimension_numbers<[1], [0], [0], [1], [0, 0, 1, 1], [], []>} : vector<16x32xf32>, vector<32x128xf32>, vector<16x128xf32> -> vector<16x128xf32>
    %7 = arith.addf %3, %6 : vector<16x128xf32>
    %c0_6 = arith.constant 0 : index
    %c0_7 = arith.constant 0 : index
    %8 = vector.load %arg7[%c0_6, %c0_7] : memref<16x128xf32, #tpu.memory_space<vmem>>, vector<16x128xf32>
    tpu.vector_store %arg7[%c0_6, %c0_7], %7 {strides = array<i32>} : memref<16x128xf32, #tpu.memory_space<vmem>>, vector<16x128xf32>,
    %c0_i32_8 = arith.constant 0 : i32
    %9 = arith.cmpi eq, %arg2, %c0_i32_8 : i32
    %10 = arith.extui %9 : i1 to i32
    %c0_i32_9 = arith.constant 0 : i32
    %11 = arith.cmpi ne, %10, %c0_i32_9 : i32
    scf.if %11 {
      %c0_10 = arith.constant 0 : index
      %c0_11 = arith.constant 0 : index
      %12 = vector.load %arg7[%c0_10, %c0_11] : memref<16x128xf32, #tpu.memory_space<vmem>>, vector<16x128xf32>
      %c0_12 = arith.constant 0 : index
      %c0_13 = arith.constant 0 : index
      %13 = vector.load %arg5[%c0_12, %c0_13] : memref<1x128xf32, #tpu.memory_space<vmem>>, vector<1x128xf32>
      %14 = vector.broadcast %13 : vector<1x128xf32> to vector<16x128xf32>
      %15 = arith.addf %12, %14 : vector<16x128xf32>
      %c0_14 = arith.constant 0 : index
      %c0_15 = arith.constant 0 : index
      %16 = vector.load %arg6[%c0_14, %c0_15] : memref<16x128xf32, #tpu.memory_space<vmem>>, vector<16x128xf32>
      tpu.vector_store %arg6[%c0_14, %c0_15], %15 {strides = array<i32>} : memref<16x128xf32, #tpu.memory_space<vmem>>, vector<16x128xf32>,
    } else {
    }
    return
  }
  func.func @transform_0(%arg0: i32, %arg1: i32, %arg2: i32) -> (i32, i32) {
    %c0_i32 = arith.constant 0 : i32
    return %arg0, %arg2 : i32, i32
  }
  func.func @transform_1(%arg0: i32, %arg1: i32, %arg2: i32) -> (i32, i32) {
    %c0_i32 = arith.constant 0 : i32
    return %arg2, %arg1 : i32, i32
  }
  func.func @transform_2(%arg0: i32, %arg1: i32, %arg2: i32) -> (i32, i32) {
    %c0_i32 = arith.constant 0 : i32
    %c0_i32_0 = arith.constant 0 : i32
    return %c0_i32, %arg1 : i32, i32
  }
  func.func @transform_3(%arg0: i32, %arg1: i32, %arg2: i32) -> (i32, i32) {
    %c0_i32 = arith.constant 0 : i32
    return %arg0, %arg1 : i32, i32
  }
}

</mosaic_0001>

<bundles_post_ra>
// kernel: linear.1
= control target key start
LH: loop header
LB: loop body
LE: loop exit
PB: predicated region body
PF: predicated region fallthrough
CT: control target
= control target key end

     0   :  { %vm28_vm0 = vcmask 261120   ;;  %s209_s1 = inlined_call_operand.vmem [shape: f32[32,128], index: 1, kind: input, shape index: {}]   ;;  %s210_s0 = inlined_call_operand.vmem [shape: f32[16,32], index: 0, kind: input, shape index: {}]   ;;  %s211_s2 = inlined_call_operand.vmem [shape: f32[1,128], index: 2, kind: input, shape index: {}]   ;;  %s212_s3 = inlined_call_operand.vmem [shape: f32[16,128], index: 3, kind: output, shape index: {}]  }
   0x1   :  { %v24_v0 = vld [vmem:[%s209_s1] sm:$0xff]  ;;  %v25_v1 = vld [vmem:[%s209_s1 + $0x8] sm:$0xff]  ;;  %v26_v2 = vld [vmem:[%s209_s1 + $0x10] sm:$0xff] }
   0x2   :  { %v154_v3 = vpack.c.bf16 %v25_v1, %v24_v0  ;;  %v27_v4 = vld [vmem:[%s209_s1 + $0x18] sm:$0xff]  ;;  %v22_v5 = vld [vmem:[%s210_s0] sm:$0xff]  ;;  %v23_v7 = vld [vmem:[%s210_s0 + $0x8] sm:$0xff] }
   0x3   :  { %v158_v6 = vpack.c.bf16 %v27_v4, %v26_v2  ;;  %151 = vmatprep.mubr.msk.f32.mxu0 %vm28_vm0, %v22_v5  ;;  %v136_v8 = vld [vmem:[%s211_s2] ss:$0 sm:$0xff] }
   0x4   :  { %155 = vmatprep.subr.bf16.mxu0 %v154_v3 }
   0x5   :  { %157 = vmatpush3.bf16.msra.mxu0 %v154_v3 }
   0x6   :  { %159 = vmatprep.subr.bf16.mxu0 %v158_v6 }
   0x9   :  { %161 = vmatpush3.bf16.msra.mxu0 %v158_v6 }
   0xc   :  { %152 = vmatmul.mubr.msk.f32.vlgmr.msra.gmra.mrb[0].mxu0 %vm28_vm0, %v23_v7 }
  0xdf   :  { %v153_v9 = vpop.f32.mrb[0].mxu0 }
  0xe0   :  { %v127_v10 = vadd.f32 %v153_v9, %v136_v8  ;;  %v101_v11 = vpop.f32.mrb[1].mxu0 }
  0xe1   :  { %v126_v12 = vadd.f32 %v136_v8, %v101_v11 }
  0xe2   :  { %129 = vst [vmem:[%s212_s3 + $0x8] sm:$0xff] %v127_v10 }
  0xe3   :  { %128 = vst [vmem:[%s212_s3] sm:$0xff] %v126_v12 }

</bundles_post_ra>
